<compile_context>
chip_gen: v7x
topology: tpu7x:2x2x1
jax: 0.10.0
libtpu: 0.0.40
codegen_flags: <defaults>
</compile_context>

<pallas_src>
import functools

import numpy as np
import jax
import jax.numpy as jnp
from jax.experimental import pallas as pl
from jax.experimental.pallas import tpu as pltpu


def _round_up(x, m):
    return (x + m - 1) // m * m


# ----------------------------------------------------------------------------
# Pallas kernel
# ----------------------------------------------------------------------------
def _gan_loss_kernel(tgt_ref, x_ref, o_ref, acc_ref, *,
                     n_valid, n_tiles, use_lsgan, need_mask, need_skip):
    c = pl.program_id(0)              # core-split axis ("parallel")
    i = pl.program_id(1)              # row-tile axis   ("arbitrary")
    tpc = pl.num_programs(1)          # tiles per core
    g_tile = c * tpc + i              # global row-tile index

    @pl.when(i == 0)
    def _():
        acc_ref[...] = jnp.zeros_like(acc_ref)

    x = x_ref[...].astype(jnp.float32)   # upcast in-kernel (input stays native)
    t = tgt_ref[0]                       # scalar target value (1.0 / 0.0), SMEM

    if use_lsgan:
        d = x - t
        val = d * d                      # MSE
    else:
        # BCEWithLogits: max(x, 0) - x*t + log1p(exp(-|x|))
        val = (jnp.maximum(x, 0.0) - x * t
               + jnp.log1p(jnp.exp(-jnp.abs(x))))

    br, lanes = val.shape                # static block dims

    def accumulate(v):
        # vreg-wise partial sums (pure VALU); cross-sublane/lane reduce is
        # deferred to the JAX finalize.
        acc_ref[...] += jnp.sum(v.reshape(br // 8, 8, lanes), axis=0)

    if need_mask:
        # Padding / undefined VMEM rows can only exist in the globally last
        # valid tile -> mask ops are gated off every other tile.
        last = n_tiles - 1

        @pl.when(g_tile < last)
        def _():
            accumulate(val)

        @pl.when(g_tile == last)
        def _():
            full_rows = n_valid // lanes          # static
            rem = n_valid % lanes                 # static
            grow = g_tile * br + jax.lax.broadcasted_iota(
                jnp.int32, (br, lanes), 0)        # global row index (no 1/elem
            lidx = jax.lax.broadcasted_iota(      #  flat index -> no i32 wrap)
                jnp.int32, (br, lanes), 1)
            keep = (grow < full_rows) | ((grow == full_rows) & (lidx < rem))
            accumulate(jnp.where(keep, val, 0.0))
        # tiles with g_tile > last (odd core split) accumulate nothing.
    elif need_skip:
        @pl.when(g_tile < n_tiles)
        def _():
            accumulate(val)
    else:
        accumulate(val)

    @pl.when(i == tpc - 1)
    def _():
        o_ref[...] = acc_ref[...]


# ----------------------------------------------------------------------------
# Wrapper (== GANLoss.forward)
# ----------------------------------------------------------------------------
def gan_loss(prediction, target_is_real, use_lsgan=True, block_rows=4096):
    """Scalar mean loss, matching the PyTorch GANLoss module's forward()."""
    pred = jnp.asarray(prediction)
    lanes = 128
    n = int(np.prod(pred.shape))

    # Native-dtype sublane packing (f32: 8 rows/vreg, bf16/f16: 16, int8/fp8: 32).
    itemsize = jnp.dtype(pred.dtype).itemsize
    sub = {4: 8, 2: 16, 1: 32}.get(itemsize, 8)

    flat = pred.reshape(-1)                          # no dtype cast, no copy
    # Only pad up to lane/sublane granularity when strictly necessary
    # (< sub*128 elements, i.e. < one tile); never pad to a block multiple.
    padded = max(_round_up(n, lanes), sub * lanes)
    if padded != n:
        flat = jnp.pad(flat, (0, padded - n))
    rows = padded // lanes
    x2d = flat.reshape(rows, lanes)

    # Row-tile size: multiple of `sub`, never exceeding the array.
    br = max(sub, (min(block_rows, rows) // sub) * sub)
    tiles = pl.cdiv(rows, br)
    nc = 2 if tiles >= 2 else 1                      # TC split (v7x megacore)
    tpc = pl.cdiv(tiles, nc)

    need_mask = (rows * lanes != n) or (rows % br != 0)
    need_skip = (nc * tpc != tiles)

    # 1.0 if real else 0.0, as a (1,) f32 SMEM operand (no recompile per flag).
    tgt = jnp.where(jnp.asarray(target_is_real),
                    jnp.float32(1.0), jnp.float32(0.0)).reshape(1)

    kern = functools.partial(_gan_loss_kernel, n_valid=n, n_tiles=tiles,
                             use_lsgan=bool(use_lsgan),
                             need_mask=need_mask, need_skip=need_skip)

    def x_map(c, i):
        # Clamp so an over-hanging step of an odd core split stays in bounds
        # (its contribution is skipped inside the kernel).
        return (jnp.minimum(c * tpc + i, tiles - 1), 0)

    partials = pl.pallas_call(
        kern,
        out_shape=jax.ShapeDtypeStruct((nc, 8, lanes), jnp.float32),
        grid=(nc, tpc),
        in_specs=[pl.BlockSpec(memory_space=pltpu.SMEM),       # target scalar
                  pl.BlockSpec((br, lanes), x_map)],           # pred tiles
        out_specs=pl.BlockSpec((None, 8, lanes), lambda c, i: (c, 0, 0)),
        scratch_shapes=[pltpu.VMEM((8, lanes), jnp.float32)],
        compiler_params=pltpu.CompilerParams(
            dimension_semantics=("parallel", "arbitrary")),
    )(tgt, x2d)

    # Tiny finalisation (nc*8*128 floats): full reduce + mean.
    return jnp.sum(partials) / jnp.float32(n)


# ----------------------------------------------------------------------------
# Pure-JAX reference for validation
# ----------------------------------------------------------------------------
def gan_loss_ref(prediction, target_is_real, use_lsgan=True):
    t = 1.0 if target_is_real else 0.0
    target = jnp.full_like(prediction, t)
    if use_lsgan:
        return jnp.mean((prediction - target) ** 2)
    x, z = prediction, target
    return jnp.mean(jnp.maximum(x, 0.0) - x * z
                    + jnp.log1p(jnp.exp(-jnp.abs(x))))


if __name__ == "__main__":
    key = jax.random.PRNGKey(0)
    # Discriminator-style prediction maps (logits).
    preds = {
        "patch_2x4x16x16_f32": jax.random.normal(key, (2, 4, 16, 16),
                                                 jnp.float32),
        "patch_2x1x30x30_f32": jax.random.normal(jax.random.fold_in(key, 1),
                                                 (2, 1, 30, 30), jnp.float32),
        "patch_2x4x16x16_bf16": jax.random.normal(jax.random.fold_in(key, 2),
                                                  (2, 4, 16, 16),
                                                  jnp.float32
                                                  ).astype(jnp.bfloat16),
    }
    for name, p in preds.items():
        for use_lsgan in (True, False):
            for real in (True, False):
                got = jax.block_until_ready(
                    gan_loss(p, real, use_lsgan=use_lsgan))
                want = gan_loss_ref(p.astype(jnp.float32), real,
                                    use_lsgan=use_lsgan)
                np.testing.assert_allclose(np.asarray(got), np.asarray(want),
                                           rtol=1e-5, atol=1e-6)
                assert np.isfinite(np.asarray(got))
    print("KERNEL_OK")
</pallas_src>

<mosaic_0001>
module attributes {stable_mosaic.version = 11 : i64} {
  func.func @_gan_loss_kernel(%arg0: i32, %arg1: i32, %arg2: memref<1xf32, #tpu.memory_space<smem>>, %arg3: memref<16x128xf32, #tpu.memory_space<vmem>>, %arg4: memref<1x8x128xf32, #tpu.memory_space<vmem>>, %arg5: memref<8x128xf32, #tpu.memory_space<vmem>>) attributes {dimension_semantics = [#tpu.dimension_semantics<parallel>, #tpu.dimension_semantics<arbitrary>], iteration_bounds = array<i64: 1, 1>, scalar_prefetch = 0 : i64, scratch_operands = 1 : i64, tpu.core_type = #tpu.core_type<tc>, window_params = [{transform_indices = @transform_0, window_bounds = array<i64: 1>}, {transform_indices = @transform_1, window_bounds = array<i64: 16, 128>}, {transform_indices = @transform_2, window_bounds = array<i64: 1, 8, 128>}]} {
    %c0_i32 = arith.constant 0 : i32
    %0 = arith.cmpi eq, %arg1, %c0_i32 : i32
    %1 = arith.extui %0 : i1 to i32
    %c0_i32_0 = arith.constant 0 : i32
    %2 = arith.cmpi ne, %1, %c0_i32_0 : i32
    scf.if %2 {
      %cst_9 = arith.constant 0.000000e+00 : f32
      %16 = vector.broadcast %cst_9 : f32 to vector<8x128xf32>
      %c0_10 = arith.constant 0 : index
      %c0_11 = arith.constant 0 : index
      %17 = vector.load %arg5[%c0_10, %c0_11] : memref<8x128xf32, #tpu.memory_space<vmem>>, vector<8x128xf32>
      tpu.vector_store %arg5[%c0_10, %c0_11], %16 {strides = array<i32>} : memref<8x128xf32, #tpu.memory_space<vmem>>, vector<8x128xf32>,
    } else {
    }
    %c0 = arith.constant 0 : index
    %c0_1 = arith.constant 0 : index
    %3 = vector.load %arg3[%c0, %c0_1] : memref<16x128xf32, #tpu.memory_space<vmem>>, vector<16x128xf32>
    %c0_2 = arith.constant 0 : index
    %4 = memref.load %arg2[%c0_2] : memref<1xf32, #tpu.memory_space<smem>>
    %5 = vector.broadcast %4 : f32 to vector<16x128xf32>
    %6 = arith.subf %3, %5 : vector<16x128xf32>
    %7 = arith.mulf %6, %6 : vector<16x128xf32>
    %c0_3 = arith.constant 0 : index
    %c0_4 = arith.constant 0 : index
    %8 = vector.load %arg5[%c0_3, %c0_4] : memref<8x128xf32, #tpu.memory_space<vmem>>, vector<8x128xf32>
    %9 = vector.shape_cast %7 : vector<16x128xf32> to vector<2x8x128xf32>
    %cst = arith.constant dense<0.000000e+00> : vector<8x128xf32>
    %10 = vector.multi_reduction <add>, %9, %cst [0] : vector<2x8x128xf32> to vector<8x128xf32>
    %11 = arith.addf %8, %10 : vector<8x128xf32>
    %c0_5 = arith.constant 0 : index
    %c0_6 = arith.constant 0 : index
    %12 = vector.load %arg5[%c0_5, %c0_6] : memref<8x128xf32, #tpu.memory_space<vmem>>, vector<8x128xf32>
    tpu.vector_store %arg5[%c0_5, %c0_6], %11 {strides = array<i32>} : memref<8x128xf32, #tpu.memory_space<vmem>>, vector<8x128xf32>,
    %c0_i32_7 = arith.constant 0 : i32
    %13 = arith.cmpi eq, %arg1, %c0_i32_7 : i32
    %14 = arith.extui %13 : i1 to i32
    %c0_i32_8 = arith.constant 0 : i32
    %15 = arith.cmpi ne, %14, %c0_i32_8 : i32
    scf.if %15 {
      %c0_9 = arith.constant 0 : index
      %c0_10 = arith.constant 0 : index
      %16 = vector.load %arg5[%c0_9, %c0_10] : memref<8x128xf32, #tpu.memory_space<vmem>>, vector<8x128xf32>
      %c0_11 = arith.constant 0 : index
      %c0_12 = arith.constant 0 : index
      %c0_13 = arith.constant 0 : index
      %17 = vector.load %arg4[%c0_11, %c0_12, %c0_13] : memref<1x8x128xf32, #tpu.memory_space<vmem>>, vector<1x8x128xf32>
      %18 = vector.shape_cast %17 : vector<1x8x128xf32> to vector<8x128xf32>
      %19 = vector.shape_cast %16 : vector<8x128xf32> to vector<1x8x128xf32>
      tpu.vector_store %arg4[%c0_11, %c0_12, %c0_13], %19 {strides = array<i32>} : memref<1x8x128xf32, #tpu.memory_space<vmem>>, vector<1x8x128xf32>,
    } else {
    }
    return
  }
  func.func @transform_0(%arg0: i32, %arg1: i32) -> i32 {
    %c0_i32 = arith.constant 0 : i32
    %c0_i32_0 = arith.constant 0 : i32
    return %c0_i32 : i32
  }
  func.func @transform_1(%arg0: i32, %arg1: i32) -> (i32, i32) {
    %c1_i32 = arith.constant 1 : i32
    %0 = arith.muli %arg0, %c1_i32 : i32
    %1 = arith.addi %0, %arg1 : i32
    %c0_i32 = arith.constant 0 : i32
    %2 = arith.minsi %1, %c0_i32 : i32
    %c0_i32_0 = arith.constant 0 : i32
    %c0_i32_1 = arith.constant 0 : i32
    return %2, %c0_i32_0 : i32, i32
  }
  func.func @transform_2(%arg0: i32, %arg1: i32) -> (i32, i32, i32) {
    %c0_i32 = arith.constant 0 : i32
    %c0_i32_0 = arith.constant 0 : i32
    %c0_i32_1 = arith.constant 0 : i32
    return %arg0, %c0_i32, %c0_i32_0 : i32, i32, i32
  }
}

</mosaic_0001>

<bundles_post_ra>
// kernel: tpu_custom_call.1
= control target key start
LH: loop header
LB: loop body
LE: loop exit
PB: predicated region body
PF: predicated region fallthrough
CT: control target
= control target key end

     0   :  { %8 = vsyncpa [#allocation5], 0  ;;  %s174_s0 = inlined_call_operand.<no memory space> [shape: f32[1], index: 0, kind: input, shape index: {}]   ;;  %s175_s1 = inlined_call_operand.hbm [shape: f32[16,128], index: 1, kind: input, shape index: {}]   ;;  %s176_s2 = inlined_call_operand.hbm [shape: f32[1,8,128], index: 2, kind: output, shape index: {}]  }
   0x1   :  { %9 = vsyncpa [#allocation6], 0  ;;  %s128_s9 = smov [#allocation4]   ;;  %s80_s13 = scalar_lea.hbm %s175_s1, 256 }
   0x2   :  { %s23_s10 = sshll.u32 %s128_s9, 4  ;;  %p81_p0 = scmp.ne.s32.totalorder %s175_s1, %s80_s13  ;;  %s24_s10 = int_to_ptr.vmem [resolvable:$true] %s23_s10 }
   0x3   :  { %p84_p1 = scmp.lt.u32.totalorder %s80_s13, %s175_s1 }
   0x5   :  { %p86_p2 = pnand %p84_p1, %p81_p0 }
   0x7   :  { %89 = shalt.err (!%p86_p2)
}
   0x8   :  { %s90_s18 = scalar_lea.vmem %s24_s10, 256  ;;  %p95_p4 = scmp.lt.s32.totalorder %s24_s10, %s24_s10 }
   0x9   :  { %p91_p3 = scmp.ne.s32.totalorder %s24_s10, %s90_s18  ;;  %p96_p5 = scmp.lt.s32.totalorder %s90_s18, %s90_s18 }
   0xb   :  { %p97_p6 = por %p96_p5, %p95_p4 }
   0xd   :  { %p98_p7 = pnand %p97_p6, %p91_p3 }
   0xf   :  { %101 = shalt.err (!%p98_p7)
}
  0x10   :  { %s129_s19 = smov 128   ;;  %s130_s20 = smov 8  }
  0x11   :  { %29 = dma.hbm_to_vmem [thread:$0]  %s175_s1, 256, %s24_s10, [#allocation5], %s129_s19, %s129_s19, %s130_s20  }
  0x12   :  { %124 = dma.done.wait [#allocation5], 256  }
  0x13   :  { %125 = vsyncadd [#allocation5], 4294967040  ;;  %v45_v0 = vstv %s174_s0  ;;  %v42_v1 = vld [vmem:[#allocation4] sm:$0xff]  ;;  %v43_v2 = vld [vmem:[#allocation4 + $0x8] sm:$0xff]  ;;  %s131_s25 = smov [#allocation7]  }
  0x14   :  { %v46_v3 = vsub.f32 %v42_v1, %v45_v0  ;;  %v47_v4 = vsub.f32 %v43_v2, %v45_v0  ;;  %s65_s26 = sshll.u32 %s131_s25, 4  ;;  %s66_s26 = int_to_ptr.vmem [resolvable:$true] %s65_s26 }
  0x15   :  { %s102_s27 = scalar_lea.vmem %s66_s26, 128  ;;  %p107_p9 = scmp.lt.s32.totalorder %s66_s26, %s66_s26 }
  0x16   :  { %v48_v5 = vmul.f32 %v46_v3, %v46_v3  ;;  %v49_v6 = vmul.f32 %v47_v4, %v47_v4  ;;  %p103_p8 = scmp.ne.s32.totalorder %s66_s26, %s102_s27  ;;  %p108_p10 = scmp.lt.s32.totalorder %s102_s27, %s102_s27 }
  0x18   :  { %v51_v7 = vadd.f32 %v49_v6, %v48_v5  ;;  %p109_p11 = por %p108_p10, %p107_p9 }
  0x1a   :  { %58 = vst [vmem:[#allocation7] sm:$0xff] %v51_v7  ;;  %p110_p12 = pnand %p109_p11, %p103_p8 }
  0x1c   :  { %113 = shalt.err (!%p110_p12)
}
  0x1d   :  { %s114_s28 = scalar_lea.hbm %s176_s2, 128 }
  0x1e   :  { %p115_p13 = scmp.ne.s32.totalorder %s176_s2, %s114_s28  ;;  %p118_p0 = scmp.lt.u32.totalorder %s114_s28, %s176_s2 }
  0x20   :  { %p120_p1 = pnand %p118_p0, %p115_p13 }
  0x22   :  { %123 = shalt.err (!%p120_p1)
}
  0x23   :  { %68 = dma.vmem_to_hbm [thread:$0]  %s66_s26, 128, %s176_s2, [#allocation6]  }
  0x24   :  { %126 = dma.done.wait [#allocation6], 128  }
  0x25   :  { %127 = vsyncadd [#allocation6], 4294967168 }
  0x26   :  { %72 = vsyncpa [#allocation5], 1 }
  0x27   :  { %73 = vsyncpa [#allocation6], 1 }

</bundles_post_ra>
